<compile_context>
chip_gen: v7x
topology: tpu7x:2x2x1
jax: 0.10.0
libtpu: 0.0.40
codegen_flags: <defaults>
</compile_context>

<pallas_src>
import functools

import jax
import jax.numpy as jnp
from jax.experimental import pallas as pl
from jax.experimental.pallas import tpu as pltpu

LANE = 128


# ----------------------------------------------------------------------------
# kernel
# ----------------------------------------------------------------------------
def _function_basis_kernel(w_ref, img_ref, o_ref, *, num_nodes):
    """Fused hat-basis expansion + 'bcf' contraction for one (b, c) row.

    w_ref:   (BC, D) f32 weights in SMEM (scalar reads).
    img_ref: (1, s_tile, 128) pixel block (native dtype) for row r = program_id(0).
    o_ref:   (1, s_tile, 128) output block.

    sum_d relu(1 - |s - d|) * w[d]  ==  piecewise-linear interp of w at s
    (with f = clamp(floor(s), 0, D-2) this form is exact everywhere, including
     out-of-range s where the relu clamps contributions to 0).
    """
    r = pl.program_id(0)
    D = num_nodes
    img = img_ref[0].astype(jnp.float32)                    # (s_tile, 128)

    if D == 1:                                              # degenerate: out = w[0]
        o_ref[0] = jnp.full_like(img, w_ref[r, 0]).astype(o_ref.dtype)
        return

    s = img * jnp.float32(D - 1)                            # hoisted scale
    f = jnp.minimum(jnp.maximum(jnp.floor(s), 0.0), jnp.float32(D - 2))
    t = s - f
    b_lo = jnp.maximum(1.0 - jnp.abs(t), 0.0)
    b_hi = jnp.maximum(1.0 - jnp.abs(t - 1.0), 0.0)

    # Gather w[f] / w[f+1] via a compare/select chain over SMEM scalars.
    w_lo = jnp.full_like(s, w_ref[r, 0])
    w_hi = jnp.full_like(s, w_ref[r, 1])
    for d in range(1, D - 1):                               # static unroll (D small)
        m = f == jnp.float32(d)
        w_lo = jnp.where(m, w_ref[r, d], w_lo)
        w_hi = jnp.where(m, w_ref[r, d + 1], w_hi)

    o_ref[0] = (b_lo * w_lo + b_hi * w_hi).astype(o_ref.dtype)


# ----------------------------------------------------------------------------
# wrapper
# ----------------------------------------------------------------------------
def function_basis_forward(image, parameters, basis_dimension, *,
                           max_block_sublanes=2048):
    """FunctionBasis.forward.

    image:      (B, 3, H, W)
    parameters: (B, 3*D)   (viewed as (B, 3, D), matching the module)
    returns:    (B, 3, H, W)
    """
    B, C, H, W = image.shape
    D = int(basis_dimension)
    assert parameters.shape == (B, C * D), (parameters.shape, (B, C * D))

    BC = B * C
    HW = H * W

    # Tiny weight table -> f32, whole array in SMEM.
    w_flat = parameters.reshape(BC, D).astype(jnp.float32)

    # Sublane-dense pixel layout: (BC, S_pad, 128); block = (1, s_tile, 128).
    S_total = -(-HW // LANE)                                 # ceil(HW / 128)
    if S_total >= 8:
        s_tile = min(S_total, max_block_sublanes)
        s_tile -= s_tile % 8                                 # keep multiple of 8
    else:
        s_tile = S_total                                     # full dim (always legal)
    S_pad = -(-S_total // s_tile) * s_tile
    pad = S_pad * LANE - HW

    img_flat = image.reshape(BC, HW)                         # native dtype, no f32 copy
    if pad:
        img_flat = jnp.pad(img_flat, ((0, 0), (0, pad)))     # garbage lanes sliced off
    img3 = img_flat.reshape(BC, S_pad, LANE)

    out_dtype = jnp.promote_types(image.dtype, parameters.dtype)
    grid = (BC, S_pad // s_tile)

    out = pl.pallas_call(
        functools.partial(_function_basis_kernel, num_nodes=D),
        grid=grid,
        in_specs=[
            pl.BlockSpec(memory_space=pltpu.MemorySpace.SMEM),          # weights
            pl.BlockSpec((1, s_tile, LANE), lambda r, j: (r, j, 0)),    # pixel tile
        ],
        out_specs=pl.BlockSpec((1, s_tile, LANE), lambda r, j: (r, j, 0)),
        out_shape=jax.ShapeDtypeStruct((BC, S_pad, LANE), out_dtype),
        compiler_params=pltpu.CompilerParams(
            dimension_semantics=("parallel", "parallel")),   # megacore sharding on v7x
    )(w_flat, img3)

    out = out.reshape(BC, S_pad * LANE)[:, :HW]
    return out.reshape(B, C, H, W)


# ----------------------------------------------------------------------------
# pure-JAX reference (the module's forward, for verification)
# ----------------------------------------------------------------------------
def _reference(image, parameters, D):
    B, C, H, W = image.shape
    scale = float(D - 1)
    d_idx = jnp.arange(D, dtype=jnp.float32).reshape(1, 1, D, 1, 1)
    basis = jnp.maximum(1.0 - jnp.abs(scale * image[:, :, None, :, :] - d_idx), 0.0)
    w = parameters.reshape(B, C, D)
    return jnp.einsum('bcfij,bcf->bcij', basis, w)


# ----------------------------------------------------------------------------
if __name__ == "__main__":
    key = jax.random.PRNGKey(0)
    k1, k2, k3, k4, k5, k6 = jax.random.split(key, 6)

    # case 1: small, 128-aligned (H*W = 256 -> one (2,128) block per row)
    B, C, D = 2, 3, 8
    image = jax.random.uniform(k1, (B, C, 16, 16), jnp.float32)
    parameters = jax.random.normal(k2, (B, C * D), jnp.float32) * 0.1
    out = jax.block_until_ready(function_basis_forward(image, parameters, D))
    assert out.shape == (B, C, 16, 16), out.shape
    assert bool(jnp.all(jnp.isfinite(out)))
    assert bool(jnp.allclose(out, _reference(image, parameters, D), atol=1e-5, rtol=1e-5))

    # case 2: larger, includes out-of-range pixel values (exercise the clamp path)
    B, C, D = 2, 3, 10
    image2 = jax.random.uniform(k3, (B, C, 64, 64), jnp.float32) * 1.5 - 0.25
    parameters2 = jax.random.normal(k4, (B, C * D), jnp.float32) * 0.1
    out2 = jax.block_until_ready(function_basis_forward(image2, parameters2, D))
    assert out2.shape == (B, C, 64, 64), out2.shape
    assert bool(jnp.all(jnp.isfinite(out2)))
    assert bool(jnp.allclose(out2, _reference(image2, parameters2, D), atol=1e-5, rtol=1e-5))

    # case 3: non-128-aligned H*W (17x19 = 323 -> padded pixel axis, output sliced)
    B, C, D = 1, 3, 6
    image3 = jax.random.uniform(k5, (B, C, 17, 19), jnp.float32)
    parameters3 = jax.random.normal(k6, (B, C * D), jnp.float32) * 0.1
    out3 = jax.block_until_ready(function_basis_forward(image3, parameters3, D))
    assert out3.shape == (B, C, 17, 19), out3.shape
    assert bool(jnp.all(jnp.isfinite(out3)))
    assert bool(jnp.allclose(out3, _reference(image3, parameters3, D), atol=1e-5, rtol=1e-5))

    print("KERNEL_OK")
</pallas_src>

<mosaic_0001>
module attributes {stable_mosaic.version = 11 : i64} {
  func.func @_function_basis_kernel(%arg0: i32, %arg1: i32, %arg2: memref<6x8xf32, #tpu.memory_space<smem>>, %arg3: memref<1x2x128xf32, #tpu.memory_space<vmem>>, %arg4: memref<1x2x128xf32, #tpu.memory_space<vmem>>) attributes {dimension_semantics = [#tpu.dimension_semantics<parallel>, #tpu.dimension_semantics<parallel>], iteration_bounds = array<i64: 6, 1>, scalar_prefetch = 0 : i64, scratch_operands = 0 : i64, tpu.core_type = #tpu.core_type<tc>, window_params = [{transform_indices = @transform_0, window_bounds = array<i64: 6, 8>}, {transform_indices = @transform_1, window_bounds = array<i64: 1, 2, 128>}, {transform_indices = @transform_2, window_bounds = array<i64: 1, 2, 128>}]} {
    %c0 = arith.constant 0 : index
    %c0_0 = arith.constant 0 : index
    %c0_1 = arith.constant 0 : index
    %0 = vector.load %arg3[%c0, %c0_0, %c0_1] : memref<1x2x128xf32, #tpu.memory_space<vmem>>, vector<1x2x128xf32>
    %1 = vector.shape_cast %0 : vector<1x2x128xf32> to vector<2x128xf32>
    %cst = arith.constant 7.000000e+00 : f32
    %2 = vector.broadcast %cst : f32 to vector<2x128xf32>
    %3 = arith.mulf %1, %2 : vector<2x128xf32>
    %4 = math.floor %3 : vector<2x128xf32>
    %cst_2 = arith.constant 0.000000e+00 : f32
    %5 = vector.broadcast %cst_2 : f32 to vector<2x128xf32>
    %6 = arith.maximumf %4, %5 : vector<2x128xf32>
    %cst_3 = arith.constant 6.000000e+00 : f32
    %7 = vector.broadcast %cst_3 : f32 to vector<2x128xf32>
    %8 = arith.minimumf %6, %7 : vector<2x128xf32>
    %9 = arith.subf %3, %8 : vector<2x128xf32>
    %10 = math.absf %9 : vector<2x128xf32>
    %cst_4 = arith.constant 1.000000e+00 : f32
    %11 = vector.broadcast %cst_4 : f32 to vector<2x128xf32>
    %12 = arith.subf %11, %10 : vector<2x128xf32>
    %cst_5 = arith.constant 0.000000e+00 : f32
    %13 = vector.broadcast %cst_5 : f32 to vector<2x128xf32>
    %14 = arith.maximumf %12, %13 : vector<2x128xf32>
    %cst_6 = arith.constant 1.000000e+00 : f32
    %15 = vector.broadcast %cst_6 : f32 to vector<2x128xf32>
    %16 = arith.subf %9, %15 : vector<2x128xf32>
    %17 = math.absf %16 : vector<2x128xf32>
    %cst_7 = arith.constant 1.000000e+00 : f32
    %18 = vector.broadcast %cst_7 : f32 to vector<2x128xf32>
    %19 = arith.subf %18, %17 : vector<2x128xf32>
    %cst_8 = arith.constant 0.000000e+00 : f32
    %20 = vector.broadcast %cst_8 : f32 to vector<2x128xf32>
    %21 = arith.maximumf %19, %20 : vector<2x128xf32>
    %22 = arith.index_cast %arg0 : i32 to index
    %c0_9 = arith.constant 0 : index
    %23 = memref.load %arg2[%22, %c0_9] : memref<6x8xf32, #tpu.memory_space<smem>>
    %24 = vector.broadcast %23 : f32 to vector<2x128xf32>
    %25 = arith.index_cast %arg0 : i32 to index
    %c1 = arith.constant 1 : index
    %26 = memref.load %arg2[%25, %c1] : memref<6x8xf32, #tpu.memory_space<smem>>
    %27 = vector.broadcast %26 : f32 to vector<2x128xf32>
    %cst_10 = arith.constant 1.000000e+00 : f32
    %28 = vector.broadcast %cst_10 : f32 to vector<2x128xf32>
    %29 = arith.cmpf oeq, %8, %28 : vector<2x128xf32>
    %30 = arith.index_cast %arg0 : i32 to index
    %c1_11 = arith.constant 1 : index
    %31 = memref.load %arg2[%30, %c1_11] : memref<6x8xf32, #tpu.memory_space<smem>>
    %32 = vector.broadcast %31 : f32 to vector<2x128xf32>
    %33 = arith.select %29, %32, %24 : vector<2x128xi1>, vector<2x128xf32>
    %34 = arith.index_cast %arg0 : i32 to index
    %c2 = arith.constant 2 : index
    %35 = memref.load %arg2[%34, %c2] : memref<6x8xf32, #tpu.memory_space<smem>>
    %36 = vector.broadcast %35 : f32 to vector<2x128xf32>
    %37 = arith.select %29, %36, %27 : vector<2x128xi1>, vector<2x128xf32>
    %cst_12 = arith.constant 2.000000e+00 : f32
    %38 = vector.broadcast %cst_12 : f32 to vector<2x128xf32>
    %39 = arith.cmpf oeq, %8, %38 : vector<2x128xf32>
    %40 = arith.index_cast %arg0 : i32 to index
    %c2_13 = arith.constant 2 : index
    %41 = memref.load %arg2[%40, %c2_13] : memref<6x8xf32, #tpu.memory_space<smem>>
    %42 = vector.broadcast %41 : f32 to vector<2x128xf32>
    %43 = arith.select %39, %42, %33 : vector<2x128xi1>, vector<2x128xf32>
    %44 = arith.index_cast %arg0 : i32 to index
    %c3 = arith.constant 3 : index
    %45 = memref.load %arg2[%44, %c3] : memref<6x8xf32, #tpu.memory_space<smem>>
    %46 = vector.broadcast %45 : f32 to vector<2x128xf32>
    %47 = arith.select %39, %46, %37 : vector<2x128xi1>, vector<2x128xf32>
    %cst_14 = arith.constant 3.000000e+00 : f32
    %48 = vector.broadcast %cst_14 : f32 to vector<2x128xf32>
    %49 = arith.cmpf oeq, %8, %48 : vector<2x128xf32>
    %50 = arith.index_cast %arg0 : i32 to index
    %c3_15 = arith.constant 3 : index
    %51 = memref.load %arg2[%50, %c3_15] : memref<6x8xf32, #tpu.memory_space<smem>>
    %52 = vector.broadcast %51 : f32 to vector<2x128xf32>
    %53 = arith.select %49, %52, %43 : vector<2x128xi1>, vector<2x128xf32>
    %54 = arith.index_cast %arg0 : i32 to index
    %c4 = arith.constant 4 : index
    %55 = memref.load %arg2[%54, %c4] : memref<6x8xf32, #tpu.memory_space<smem>>
    %56 = vector.broadcast %55 : f32 to vector<2x128xf32>
    %57 = arith.select %49, %56, %47 : vector<2x128xi1>, vector<2x128xf32>
    %cst_16 = arith.constant 4.000000e+00 : f32
    %58 = vector.broadcast %cst_16 : f32 to vector<2x128xf32>
    %59 = arith.cmpf oeq, %8, %58 : vector<2x128xf32>
    %60 = arith.index_cast %arg0 : i32 to index
    %c4_17 = arith.constant 4 : index
    %61 = memref.load %arg2[%60, %c4_17] : memref<6x8xf32, #tpu.memory_space<smem>>
    %62 = vector.broadcast %61 : f32 to vector<2x128xf32>
    %63 = arith.select %59, %62, %53 : vector<2x128xi1>, vector<2x128xf32>
    %64 = arith.index_cast %arg0 : i32 to index
    %c5 = arith.constant 5 : index
    %65 = memref.load %arg2[%64, %c5] : memref<6x8xf32, #tpu.memory_space<smem>>
    %66 = vector.broadcast %65 : f32 to vector<2x128xf32>
    %67 = arith.select %59, %66, %57 : vector<2x128xi1>, vector<2x128xf32>
    %cst_18 = arith.constant 5.000000e+00 : f32
    %68 = vector.broadcast %cst_18 : f32 to vector<2x128xf32>
    %69 = arith.cmpf oeq, %8, %68 : vector<2x128xf32>
    %70 = arith.index_cast %arg0 : i32 to index
    %c5_19 = arith.constant 5 : index
    %71 = memref.load %arg2[%70, %c5_19] : memref<6x8xf32, #tpu.memory_space<smem>>
    %72 = vector.broadcast %71 : f32 to vector<2x128xf32>
    %73 = arith.select %69, %72, %63 : vector<2x128xi1>, vector<2x128xf32>
    %74 = arith.index_cast %arg0 : i32 to index
    %c6 = arith.constant 6 : index
    %75 = memref.load %arg2[%74, %c6] : memref<6x8xf32, #tpu.memory_space<smem>>
    %76 = vector.broadcast %75 : f32 to vector<2x128xf32>
    %77 = arith.select %69, %76, %67 : vector<2x128xi1>, vector<2x128xf32>
    %cst_20 = arith.constant 6.000000e+00 : f32
    %78 = vector.broadcast %cst_20 : f32 to vector<2x128xf32>
    %79 = arith.cmpf oeq, %8, %78 : vector<2x128xf32>
    %80 = arith.index_cast %arg0 : i32 to index
    %c6_21 = arith.constant 6 : index
    %81 = memref.load %arg2[%80, %c6_21] : memref<6x8xf32, #tpu.memory_space<smem>>
    %82 = vector.broadcast %81 : f32 to vector<2x128xf32>
    %83 = arith.select %79, %82, %73 : vector<2x128xi1>, vector<2x128xf32>
    %84 = arith.index_cast %arg0 : i32 to index
    %c7 = arith.constant 7 : index
    %85 = memref.load %arg2[%84, %c7] : memref<6x8xf32, #tpu.memory_space<smem>>
    %86 = vector.broadcast %85 : f32 to vector<2x128xf32>
    %87 = arith.select %79, %86, %77 : vector<2x128xi1>, vector<2x128xf32>
    %88 = arith.mulf %14, %83 : vector<2x128xf32>
    %89 = arith.mulf %21, %87 : vector<2x128xf32>
    %90 = arith.addf %88, %89 : vector<2x128xf32>
    %c0_22 = arith.constant 0 : index
    %c0_23 = arith.constant 0 : index
    %c0_24 = arith.constant 0 : index
    %91 = vector.load %arg4[%c0_22, %c0_23, %c0_24] : memref<1x2x128xf32, #tpu.memory_space<vmem>>, vector<1x2x128xf32>
    %92 = vector.shape_cast %91 : vector<1x2x128xf32> to vector<2x128xf32>
    %93 = vector.shape_cast %90 : vector<2x128xf32> to vector<1x2x128xf32>
    tpu.vector_store %arg4[%c0_22, %c0_23, %c0_24], %93 {strides = array<i32>} : memref<1x2x128xf32, #tpu.memory_space<vmem>>, vector<1x2x128xf32>,
    return
  }
  func.func @transform_0(%arg0: i32, %arg1: i32) -> (i32, i32) {
    %c0_i32 = arith.constant 0 : i32
    %c0_i32_0 = arith.constant 0 : i32
    %c0_i32_1 = arith.constant 0 : i32
    return %c0_i32, %c0_i32_0 : i32, i32
  }
  func.func @transform_1(%arg0: i32, %arg1: i32) -> (i32, i32, i32) {
    %c0_i32 = arith.constant 0 : i32
    %c0_i32_0 = arith.constant 0 : i32
    return %arg0, %arg1, %c0_i32 : i32, i32, i32
  }
  func.func @transform_2(%arg0: i32, %arg1: i32) -> (i32, i32, i32) {
    %c0_i32 = arith.constant 0 : i32
    %c0_i32_0 = arith.constant 0 : i32
    return %arg0, %arg1, %c0_i32 : i32, i32, i32
  }
}

</mosaic_0001>

<bundles_post_ra>
// kernel: tpu_custom_call.1
= control target key start
LH: loop header
LB: loop body
LE: loop exit
PB: predicated region body
PF: predicated region fallthrough
CT: control target
= control target key end

     0   :  { %7 = vsyncpa [#allocation5], 0  ;;  %s831_s0 = inlined_call_operand.hbm [shape: f32[6,8], index: 0, kind: input, shape index: {}]   ;;  %s832_s1 = inlined_call_operand.hbm [shape: f32[6,2,128], index: 1, kind: input, shape index: {}]   ;;  %s833_s2 = inlined_call_operand.hbm [shape: f32[6,2,128], index: 2, kind: output, shape index: {}]  }
   0x1   :  { %8 = vsyncpa [#allocation3], 0 }
   0x2   :  { %10 = vsyncpa [#allocation3 + $0x1], 0 }
   0x3   :  { %11 = vsyncpa [#allocation4], 0 }
   0x4   :  { %13 = vsyncpa [#allocation4 + $0x1], 0  ;;  %s593_s9 = smov 0   ;;  %s595_s10 = smov 0  }
   0x5   :  { %s597_s11 = smov 0   ;;  %s599_s12 = smov 0  }
   0x6   :  { %s601_s13 = smov 0   ;;  %s603_s14 = smov 0  }
   0x7 LB: > { %s354_s15 = sadd.s32 4294967295, %s573_s14   ;;  %s355_s16 = sadd.s32 4294967294, %s573_s14   ;;  %s573_s14 = sphi %s603_s14, %s19_s14   ;;  %s569_s13 = sphi %s601_s13, %s856_s13   ;;  %s565_s12 = sphi %s599_s12, %s855_s12   ;;  %s561_s11 = sphi %s597_s11, %s854_s11   ;;  %s557_s10 = sphi %s595_s10, %s853_s10   ;;  %s553_s9 = sphi %s593_s9, %s852_s9  }
   0x8   : > { %p74_p0 = scmp.ne.s32.totalorder %s557_s10, %s553_s9  ;;  %p627_p1 = scmp.eq.s32.totalorder %s354_s15, 0 }
   0x9   : > { %p631_p2 = scmp.eq.s32.totalorder %s354_s15, 5  ;;  %p106_p3 = scmp.eq.s32.totalorder %s355_s16, 5 }
   0xa   : > { %s838_s17 = scalar_select %p627_p1, 1, 0 }
   0xb   : > { %p637_p4 = por %p627_p1, %p74_p0  ;;  %p356_p5 = scmp.ge.s32.totalorder %s573_s14, 1 }
   0xc   : > { %p642_p6 = por %p106_p3, %p74_p0  ;;  %p113_p7 = scmp.lt.s32.totalorder %s573_s14, 7 }
   0xd   : > { %s840_s19 = scalar_select %p637_p4, 1, 0 }
   0xe   : > { %s841_s20 = scalar_select %p642_p6, 1, 0 }
   0xf   : > { %p647_p8 = pnand %p356_p5, %p113_p7  ;;  %s31_s22 = sadd.s32 1, %s569_s13 }
  0x10   : > { %p660_p11 = scmp.ge.s32.totalorder %s31_s22, 6  ;;  %s61_s25 = sadd.s32 1, %s561_s11 }
  0x11   : > { %p379_p9 = pneg %p647_p8  ;;  %p68_p12 = scmp.ne.s32.totalorder %s561_s11, %s557_s10 }
  0x12   : > { %p69_p13 = scmp.eq.s32.totalorder %s573_s14, 0  ;;  %s444_s28 = scalar_lea.hbm %s831_s0, 128 }
  0x13   : > { %p656_p10 = pnand %p379_p9, %p627_p1  ;;  %p445_p0 = scmp.ne.s32.totalorder %s831_s0, %s444_s28 }
  0x14   : > { %p451_p9 = scmp.lt.u32.totalorder %s444_s28, %s831_s0 }
  0x15   : > { %p446_p3 = pneg %p656_p10 }
  0x17   : > { %p447_p5 = pnand %p446_p3, %p445_p0 }
  0x19   : > { %p448_p7 = pneg %p447_p5 }
  0x1b   : > { %p453_p6 = pnand %p451_p9, %p448_p7 }
  0x1d   : > { %456 = shalt.err (!%p453_p6)
}
  0x1e   : > { %s575_s5 = smov [#allocation2]   ;;  %s858_s22 = smov (%p660_p11, %s31_s22), 0 }
  0x1f   : > { %382 = dma.hbm_to_smem (!%p656_p10), %s831_s0, 128, %s575_s5, [#allocation5]  }
  0x20   : > { %p691_p6 = por %p69_p13, %p68_p12  ;;  %p700_p0 = por %p631_p2, %p68_p12 }
  0x21   : > { %s56_s16 = ssub.s32 %s569_s13, %s858_s22  ;;  %p392_p3 = scmp.lt.s32.totalorder %s573_s14, 6 }
  0x22   : > { %s846_s15 = scalar_select %p700_p0, 1, 0 }
  0x23   : > { %p59_p5 = scmp.eq.s32.totalorder %s56_s16, 0  ;;  %s135_s23 = sand.u32 1, %s561_s11  }
  0x24   : > { %s359_s24 = sshll.u32 %s135_s23, 1  ;;  %s360_s27 = sshll.u32 %s569_s13, 5 }
  0x25   : > { %s709_s26 = scalar_select %p59_p5, %s561_s11, %s61_s25  }
  0x26   : > { %s715_s30 = scalar_lea.hbm %s832_s1, %s360_s27  ;;  %s139_s18 = scalar_lea.vmem [#allocation6], %s359_s24 }
  0x27   : > { %s147_s3 = sshll.u32 %s139_s18, 4  ;;  %p721_p2 = pnand %p392_p3, %p691_p6  ;;  %s717_s3 = int_to_ptr.vmem [resolvable:$true] %s147_s3 }
  0x28   : > { %s136_s25 = scalar_lea.sflag [#allocation3], %s135_s23  ;;  %s457_s5 = scalar_lea.hbm %s715_s30, 32 }
  0x29   : > { %p458_p10 = scmp.ne.s32.totalorder %s715_s30, %s457_s5  ;;  %p459_p11 = pneg %p721_p2 }
  0x2a   : > { %s462_s16 = scalar_lea.hbm %s832_s1, 192  ;;  %p463_p7 = scmp.lt.u32.totalorder %s715_s30, %s832_s1 }
  0x2b   : > { %p460_p12 = pnand %p459_p11, %p458_p10  ;;  %p464_p9 = scmp.lt.u32.totalorder %s462_s16, %s457_s5 }
  0x2c   : > { %p466_p3 = scmp.lt.u32.totalorder %s457_s5, %s715_s30 }
  0x2d   : > { %p461_p13 = pneg %p460_p12  ;;  %p465_p6 = por %p464_p9, %p463_p7 }
  0x2f   : > { %p467_p5 = por %p466_p3, %p465_p6 }
  0x31   : > { %p468_p0 = pnand %p467_p5, %p461_p13 }
  0x33   : > { %471 = shalt.err (!%p468_p0)
}
  0x34   : > { %s472_s23 = scalar_lea.vmem %s717_s3, 32  ;;  %s576_s27 = smov [#allocation6]  }
  0x35   : > { %p473_p10 = scmp.ne.s32.totalorder %s717_s3, %s472_s23  ;;  %s477_s28 = sshll.u32 %s576_s27, 4  ;;  %s478_s28 = int_to_ptr.vmem [resolvable:$false] %s477_s28 }
  0x36   : > { %s479_s29 = scalar_lea.vmem %s478_s28, 64  ;;  %p480_p1 = scmp.lt.s32.totalorder %s717_s3, %s478_s28 }
  0x37   : > { %p475_p12 = pnand %p473_p10, %p459_p11  ;;  %p481_p7 = scmp.lt.s32.totalorder %s479_s29, %s472_s23 }
  0x39   : > { %p476_p4 = pneg %p475_p12  ;;  %p482_p9 = por %p481_p7, %p480_p1 }
  0x3b   : > { %p483_p6 = pnand %p482_p9, %p476_p4 }
  0x3d   : > { %486 = shalt.err (!%p483_p6)
}
  0x3e   : > { %386 = dma.hbm_to_vmem [thread:$0]  (!%p721_p2), %s715_s30, 32, %s717_s3, %s136_s25  }
  0x3f   : > { %156 = sbr.rel (%p647_p8) target bundleno = 114 (0x72), region = 28  ;;  %p848_p0 = scmp.ne.s32.totalorder (!%p647_p8), %s838_s17, 0 }
  0x46   : > { %540 = dma.done.wait (%p848_p0), [#allocation5], 128  }
  0x47   : > { %542 = vsyncadd (%p848_p0), [#allocation5], 4294967168  ;;  %s757_s18 = sand.u32 1, %s557_s10   ;;  %p849_p1 = scmp.ne.s32.totalorder %s840_s19, 0 }
  0x48   : > { %s363_s4 = sshll.u32 %s757_s18, 1  ;;  %s163_s5 = scalar_lea.sflag [#allocation3], %s757_s18 }
  0x49   : > { %s166_s30 = scalar_lea.vmem [#allocation6], %s363_s4 }
  0x4a   : > { %544 = dma.done.wait (%p849_p1), %s163_s5, 32  }
  0x4b   : > { %546 = vsyncadd (%p849_p1), %s163_s5, 4294967264 }
  0x4c   : > { %171 = sfence }
  0x4d   : > { %v188_v0 = vld [vmem:[%s166_s30] sm:$0x3]  ;;  %s366_s17 = sshll.u32 %s565_s12, 7  ;;  %p850_p8 = scmp.ne.s32.totalorder %s846_s15, 0 }
  0x4e   : > { %v189_v1 = vmul.f32 7.0, %v188_v0  ;;  %s202_s21 = sld [smem:[#allocation2 + %s366_s17]]  ;;  %s204_s3 = sadd.s32 1, %s366_s17 }
  0x4f   : > { %s205_s25 = sld [smem:[#allocation2 + %s204_s3]]  ;;  %s209_s6 = sadd.s32 2, %s366_s17 }
  0x50   : > { %v190_v2 = vfloor.f32 %v189_v1  ;;  %s210_s7 = sld [smem:[#allocation2 + %s209_s6]]  ;;  %s215_s16 = sadd.s32 3, %s366_s17 }
  0x51   : > { %s216_s8 = sld [smem:[#allocation2 + %s215_s16]]  ;;  %s221_s24 = sadd.s32 4, %s366_s17 }
  0x52   : > { %v191_v3 = vmax.f32 %v190_v2, 0.0  ;;  %s222_s23 = sld [smem:[#allocation2 + %s221_s24]]  ;;  %s227_s27 = sadd.s32 5, %s366_s17 }
  0x53   : > { %s768_s28 = sld [smem:[#allocation2 + %s227_s27]]  ;;  %s233_s19 = sadd.s32 6, %s366_s17 }
  0x54   : > { %v192_v4 = vmin.f32 %v191_v3, 6.0  ;;  %v203_v5 = vstv %s202_s21  ;;  %s770_s29 = sld [smem:[#allocation2 + %s233_s19]]  ;;  %s239_s5 = sadd.s32 7, %s366_s17 }
  0x55   : > { %v206_v6 = vstv %s205_s25  ;;  %s772_s30 = sld [smem:[#allocation2 + %s239_s5]]  ;;  %s187_s17 = scalar_lea.vmem [#allocation7], %s363_s4 }
  0x56   : > { %v193_v7 = vsub.f32 %v189_v1, %v192_v4  ;;  %vm207_vm0 = vcmp.eq.f32.partialorder %v192_v4, 1.0  ;;  %v211_v8 = vstv %s210_s7  ;;  %vm213_vm1 = vcmp.eq.f32.partialorder %v192_v4, 2.0  ;;  %s262_s21 = sshll.u32 %s187_s17, 4  ;;  %s368_s3 = sshll.u32 %s565_s12, 5  ;;  %s780_s21 = int_to_ptr.vmem [resolvable:$true] %s262_s21 }
  0x57   : > { %v208_v9 = vsel %vm207_vm0, %v206_v6, %v203_v5  ;;  %v212_v10 = vsel %vm207_vm0, %v211_v8, %v206_v6  ;;  %v217_v11 = vstv %s216_s8  ;;  %vm219_vm2 = vcmp.eq.f32.partialorder %v192_v4, 3.0  ;;  %s785_s7 = scalar_lea.hbm %s833_s2, %s368_s3  ;;  %s248_s16 = scalar_lea.sflag [#allocation4], %s757_s18 }
  0x58   : > { %v194_v12 = vand.u32 2147483647, %v193_v7  ;;  %v365_v13 = vadd.f32 -1.0, %v193_v7  ;;  %v214_v14 = vsel %vm213_vm1, %v211_v8, %v208_v9  ;;  %v218_v15 = vsel %vm213_vm1, %v217_v11, %v212_v10  ;;  %s487_s8 = scalar_lea.vmem %s780_s21, 32  ;;  %s577_s12 = smov [#allocation7]  }
  0x59   : > { %v220_v16 = vsel %vm219_vm2, %v217_v11, %v214_v14  ;;  %v223_v17 = vstv %s222_s23  ;;  %vm225_vm3 = vcmp.eq.f32.partialorder %v192_v4, 4.0  ;;  %v229_v18 = vstv %s768_s28  ;;  %p488_p4 = scmp.ne.s32.totalorder %s780_s21, %s487_s8  ;;  %s491_s4 = sshll.u32 %s577_s12, 4  ;;  %s492_s4 = int_to_ptr.vmem [resolvable:$false] %s491_s4 }
  0x5a   : > { %v195_v19 = vsub.f32 1.0, %v194_v12  ;;  %v198_v20 = vand.u32 2147483647, %v365_v13  ;;  %v224_v21 = vsel %vm219_vm2, %v223_v17, %v218_v15  ;;  %v226_v22 = vsel %vm225_vm3, %v223_v17, %v220_v16  ;;  %s493_s24 = scalar_lea.vmem %s492_s4, 64  ;;  %p494_p13 = scmp.lt.s32.totalorder %s780_s21, %s492_s4 }
  0x5b   : > { %v230_v23 = vsel %vm225_vm3, %v229_v18, %v224_v21  ;;  %vm231_vm4 = vcmp.eq.f32.partialorder %v192_v4, 5.0  ;;  %v235_v24 = vstv %s770_s29  ;;  %vm237_vm5 = vcmp.eq.f32.partialorder %v192_v4, 6.0  ;;  %p489_p2 = pnand %p488_p4, %p850_p8  ;;  %p495_p3 = scmp.lt.s32.totalorder %s493_s24, %s487_s8 }
  0x5c   : > { %v196_v25 = vmax.f32 %v195_v19, 0.0  ;;  %v199_v26 = vsub.f32 1.0, %v198_v20  ;;  %v232_v27 = vsel %vm231_vm4, %v229_v18, %v226_v22  ;;  %v236_v28 = vsel %vm231_vm4, %v235_v24, %v230_v23 }
  0x5d   : > { %v238_v29 = vsel %vm237_vm5, %v235_v24, %v232_v27  ;;  %v241_v30 = vstv %s772_s30  ;;  %p490_p11 = pneg %p489_p2  ;;  %p496_p5 = por %p495_p3, %p494_p13 }
  0x5e   : > { %v200_v31 = vmax.f32 %v199_v26, 0.0  ;;  %v242_v32 = vsel %vm237_vm5, %v241_v30, %v236_v28  ;;  %v243_v33 = vmul.f32 %v238_v29, %v196_v25 }
  0x5f   : > { %p497_p10 = pnand %p496_p5, %p490_p11 }
  0x60   : > { %v244_v34 = vmul.f32 %v242_v32, %v200_v31 }
  0x62   : > { %v245_v35 = vadd.f32 %v244_v34, %v243_v33 }
  0x64   : > { %246 = vst [vmem:[%s187_s17] sm:$0x3] %v245_v35 }
  0x65   : > { %500 = shalt.err (!%p497_p10)
}
  0x66   : > { %s501_s18 = scalar_lea.hbm %s785_s7, 32  ;;  %s505_s28 = scalar_lea.hbm %s833_s2, 192 }
  0x67   : > { %p502_p12 = scmp.ne.s32.totalorder %s785_s7, %s501_s18  ;;  %p506_p6 = scmp.lt.u32.totalorder %s785_s7, %s833_s2 }
  0x68   : > { %p507_p0 = scmp.lt.u32.totalorder %s505_s28, %s501_s18  ;;  %p509_p4 = scmp.lt.u32.totalorder %s501_s18, %s785_s7 }
  0x69   : > { %p503_p7 = pnand %p502_p12, %p850_p8 }
  0x6a   : > { %p508_p1 = por %p507_p0, %p506_p6 }
  0x6b   : > { %p504_p9 = pneg %p503_p7 }
  0x6c   : > { %p510_p2 = por %p509_p4, %p508_p1 }
  0x6e   : > { %p511_p11 = pnand %p510_p2, %p504_p9 }
  0x70   : > { %514 = shalt.err (!%p511_p11)
}
  0x71   : > { %377 = dma.vmem_to_hbm [thread:$0]  (%p850_p8), %s780_s21, 32, %s785_s7, %s248_s16  }
  0x72 PF: > { %p394_p13 = scmp.ge.s32.totalorder %s573_s14, 2  ;;  %s274_s5 = sand.u32 1, %s553_s9  }
  0x73   : > { %p851_p3 = scmp.ne.s32.totalorder %s841_s20, 0  ;;  %s275_s30 = scalar_lea.sflag [#allocation4], %s274_s5 }
  0x75   : > { %p388_p5 = pnand %p394_p13, %p851_p3 }
  0x77   : > { %548 = dma.done.wait (!%p388_p5), %s275_s30, 32  }
  0x78   : > { %550 = vsyncadd (!%p388_p5), %s275_s30, 4294967264  ;;  %s19_s14 = sadd.s32 1, %s573_s14   ;;  %s852_s9 = smov %s557_s10 }
  0x79   : > { %p16_p10 = scmp.ge.s32.totalorder %s19_s14, 8   ;;  %s853_s10 = smov %s561_s11 }
  0x7a   : > { %s854_s11 = smov %s709_s26  ;;  %s855_s12 = smov %s569_s13 }
  0x7b   : > { %s856_s13 = smov %s858_s22  ;;  %18 = sbr.rel (!%p16_p10) target bundleno = 7 (0x7), region = 78 }
  0x82   :  { %280 = vsyncpa [#allocation3], 1 }
  0x83   :  { %282 = vsyncpa [#allocation3 + $0x1], 1 }
  0x84   :  { %283 = vsyncpa [#allocation4], 1 }
  0x85   :  { %285 = vsyncpa [#allocation4 + $0x1], 1 }
  0x86   :  { %286 = vsyncpa [#allocation5], 1 }
  0x87   :  { %288 = vsyncpa [#allocation5 + $0x1], 1 }

</bundles_post_ra>
